<compile_context>
chip_gen: v6e
topology: v6e:2x2x1
jax: 0.10.0
libtpu: 0.0.40
codegen_flags: <defaults>
</compile_context>

<pallas_src>
import jax
import jax.numpy as jnp
from jax import lax
from jax.experimental import pallas as pl
from jax.experimental.pallas import tpu as pltpu


def mlp_kernel(x_ref, w1_ref, b1_ref, w2_ref, b2_ref, w3t_ref, b3_ref, o_ref):
    # x_ref: (TB, D); w1: (D, 32); b1: (1, 32); w2: (32, 8); b2: (1, 8);
    # w3t: (1, 8) (final Linear(8,1) weight in (out, in) layout); b3: (1, 1);
    # o_ref: (1, 1, TB) -- batch on lanes (lane-dense store).
    x = x_ref[...]

    h1 = jnp.dot(x, w1_ref[...], preferred_element_type=jnp.float32) + b1_ref[...]
    h1 = jnp.maximum(h1, 0.0)  # nn.Relu in the source == ReLU

    h2 = jnp.dot(h1, w2_ref[...], preferred_element_type=jnp.float32) + b2_ref[...]
    h2 = jnp.maximum(h2, 0.0)

    # Final layer, transposed: (1, 8) . (TB, 8)^T -> (1, TB). The MXU handles
    # the rhs contraction on its last dim, so batch ends up on lanes with no
    # explicit in-kernel relayout/transpose.
    h3 = lax.dot_general(
        w3t_ref[...], h2,
        dimension_numbers=(((1,), (1,)), ((), ())),
        preferred_element_type=jnp.float32,
    ) + b3_ref[...]
    h3 = jnp.maximum(h3, 0.0)

    o_ref[...] = h3.reshape(o_ref.shape).astype(o_ref.dtype)


def _round_up(x, m):
    return ((x + m - 1) // m) * m


def _pick_batch_tile(batch, input_dim):
    """Largest batch tile whose double-buffered x stream + intermediates fit a
    conservative VMEM budget valid on every generation (v5e 16 MiB default
    scoped, v6e 32 MiB, v7x 64 MiB physical). Capped at 1024 rows."""
    budget = 12 * 1024 * 1024
    per_row = 2 * input_dim * 4 + 1024  # x double-buffer + f32 intermediates slack
    tb = budget // per_row
    tb = max(8, min(1024, (tb // 8) * 8))
    return min(tb, _round_up(batch, 8))


def mlp_forward(x, params, *, tb=None):
    """x: (B, D) float32. Returns (B,) float32 (matches torch's squeeze(1))."""
    w1, b1, w2, b2, w3t, b3 = params
    batch, input_dim = x.shape

    if tb is None:
        tb = _pick_batch_tile(batch, input_dim)
    grid = pl.cdiv(batch, tb)
    padded = grid * tb
    if padded != batch:
        # Pad the ragged last tile with zeros; padded rows are sliced off below.
        x = jnp.pad(x, ((0, padded - batch), (0, 0)))

    flops = 2 * padded * (input_dim * 32 + 32 * 8 + 8)
    param_bytes = 4 * (input_dim * 32 + 32 + 32 * 8 + 8 + 8 + 1)
    cost = pl.CostEstimate(
        flops=flops,
        transcendentals=0,
        bytes_accessed=padded * input_dim * 4 + padded * 4 + param_bytes,
    )

    out = pl.pallas_call(
        mlp_kernel,
        out_shape=jax.ShapeDtypeStruct((grid, 1, tb), jnp.float32),
        grid=(grid,),
        in_specs=[
            # x: streamed / double-buffered per batch tile.
            pl.BlockSpec((tb, input_dim), lambda i: (i, 0)),
            # Weights & biases: constant index maps -> loaded once, VMEM-resident.
            pl.BlockSpec((input_dim, 32), lambda i: (0, 0)),
            pl.BlockSpec((1, 32), lambda i: (0, 0)),
            pl.BlockSpec((32, 8), lambda i: (0, 0)),
            pl.BlockSpec((1, 8), lambda i: (0, 0)),
            pl.BlockSpec((1, 8), lambda i: (0, 0)),
            pl.BlockSpec((1, 1), lambda i: (0, 0)),
        ],
        out_specs=pl.BlockSpec((1, 1, tb), lambda i: (i, 0, 0)),
        compiler_params=pltpu.CompilerParams(
            dimension_semantics=("parallel",),
            vmem_limit_bytes=32 * 1024 * 1024,
        ),
        cost_estimate=cost,
    )(x, w1, b1, w2, b2, w3t, b3)

    return out.reshape(padded)[:batch]


def init_params(key, input_dim):
    """Deterministic init matching the PyTorch module's layer shapes.
    Layers 1/2 store weights as (in, out) so the kernel does x @ W; the final
    Linear(8, 1) is stored as (out, in) = (1, 8) so the kernel can contract it
    against h2's feature dim and land batch on lanes."""
    def linear_init(k, fan_in, fan_out, transpose=False):
        kw, kb = jax.random.split(k)
        bound = 1.0 / (fan_in ** 0.5)
        shape = (fan_out, fan_in) if transpose else (fan_in, fan_out)
        w = jax.random.uniform(kw, shape, jnp.float32, -bound, bound)
        b = jax.random.uniform(kb, (1, fan_out), jnp.float32, -bound, bound)
        return w, b

    k1, k2, k3 = jax.random.split(key, 3)
    w1, b1 = linear_init(k1, input_dim, 32)
    w2, b2 = linear_init(k2, 32, 8)
    w3t, b3 = linear_init(k3, 8, 1, transpose=True)  # (1, 8), (1, 1)
    return (w1, b1, w2, b2, w3t, b3)


def mlp_reference(x, params):
    w1, b1, w2, b2, w3t, b3 = params
    h = jnp.maximum(x @ w1 + b1, 0.0)
    h = jnp.maximum(h @ w2 + b2, 0.0)
    h = jnp.maximum(h @ w3t.T + b3, 0.0)
    return h[:, 0]


if __name__ == "__main__":
    key = jax.random.PRNGKey(0)
    k_params, k_x1, k_x2 = jax.random.split(key, 3)

    # Small shapes consistent with the module: batch=8, input_dim=16.
    input_dim = 16
    params = init_params(k_params, input_dim)

    x_small = jax.random.normal(k_x1, (8, input_dim), jnp.float32)
    y_small = mlp_forward(x_small, params)
    jax.block_until_ready(y_small)
    assert y_small.shape == (8,)
    assert jnp.allclose(y_small, mlp_reference(x_small, params), atol=1e-5, rtol=1e-5)

    # Ragged batch exercising the tiled/pipelined path (grid > 1 + padding).
    x_ragged = jax.random.normal(k_x2, (300, input_dim), jnp.float32)
    y_ragged = mlp_forward(x_ragged, params, tb=128)
    jax.block_until_ready(y_ragged)
    assert y_ragged.shape == (300,)
    assert jnp.allclose(y_ragged, mlp_reference(x_ragged, params), atol=1e-5, rtol=1e-5)

    print("KERNEL_OK")
</pallas_src>

<mosaic_0001>
module attributes {stable_mosaic.version = 11 : i64} {
  func.func @mlp_kernel(%arg0: i32, %arg1: memref<8x16xf32, #tpu.memory_space<vmem>>, %arg2: memref<16x32xf32, #tpu.memory_space<vmem>>, %arg3: memref<1x32xf32, #tpu.memory_space<vmem>>, %arg4: memref<32x8xf32, #tpu.memory_space<vmem>>, %arg5: memref<1x8xf32, #tpu.memory_space<vmem>>, %arg6: memref<1x8xf32, #tpu.memory_space<vmem>>, %arg7: memref<1x1xf32, #tpu.memory_space<vmem>>, %arg8: memref<1x1x8xf32, #tpu.memory_space<vmem>>) attributes {dimension_semantics = [#tpu.dimension_semantics<parallel>], iteration_bounds = array<i64: 1>, scalar_prefetch = 0 : i64, scratch_operands = 0 : i64, tpu.core_type = #tpu.core_type<tc>, window_params = [{transform_indices = @transform_0, window_bounds = array<i64: 8, 16>}, {pipeline_mode = #tpu.pipeline_mode<synchronous>, transform_indices = @transform_1, window_bounds = array<i64: 16, 32>}, {pipeline_mode = #tpu.pipeline_mode<synchronous>, transform_indices = @transform_2, window_bounds = array<i64: 1, 32>}, {pipeline_mode = #tpu.pipeline_mode<synchronous>, transform_indices = @transform_3, window_bounds = array<i64: 32, 8>}, {pipeline_mode = #tpu.pipeline_mode<synchronous>, transform_indices = @transform_4, window_bounds = array<i64: 1, 8>}, {pipeline_mode = #tpu.pipeline_mode<synchronous>, transform_indices = @transform_5, window_bounds = array<i64: 1, 8>}, {pipeline_mode = #tpu.pipeline_mode<synchronous>, transform_indices = @transform_6, window_bounds = array<i64: 1, 1>}, {transform_indices = @transform_7, window_bounds = array<i64: 1, 1, 8>}]} {
    %c0 = arith.constant 0 : index
    %c0_0 = arith.constant 0 : index
    %0 = vector.load %arg1[%c0, %c0_0] : memref<8x16xf32, #tpu.memory_space<vmem>>, vector<8x16xf32>
    %c0_1 = arith.constant 0 : index
    %c0_2 = arith.constant 0 : index
    %1 = vector.load %arg2[%c0_1, %c0_2] : memref<16x32xf32, #tpu.memory_space<vmem>>, vector<16x32xf32>
    %cst = arith.constant dense<0.000000e+00> : vector<8x32xf32>
    %2 = tpu.matmul %0, %1, %cst {dimension_numbers = #tpu.dot_dimension_numbers<[1], [0], [0], [1], [0, 0, 1, 1], [], []>} : vector<8x16xf32>, vector<16x32xf32>, vector<8x32xf32> -> vector<8x32xf32>
    %c0_3 = arith.constant 0 : index
    %c0_4 = arith.constant 0 : index
    %3 = vector.load %arg3[%c0_3, %c0_4] : memref<1x32xf32, #tpu.memory_space<vmem>>, vector<1x32xf32>
    %4 = vector.broadcast %3 : vector<1x32xf32> to vector<8x32xf32>
    %5 = arith.addf %2, %4 : vector<8x32xf32>
    %cst_5 = arith.constant 0.000000e+00 : f32
    %6 = vector.broadcast %cst_5 : f32 to vector<8x32xf32>
    %7 = arith.maximumf %5, %6 : vector<8x32xf32>
    %c0_6 = arith.constant 0 : index
    %c0_7 = arith.constant 0 : index
    %8 = vector.load %arg4[%c0_6, %c0_7] : memref<32x8xf32, #tpu.memory_space<vmem>>, vector<32x8xf32>
    %cst_8 = arith.constant dense<0.000000e+00> : vector<8x8xf32>
    %9 = tpu.matmul %7, %8, %cst_8 {dimension_numbers = #tpu.dot_dimension_numbers<[1], [0], [0], [1], [0, 0, 1, 1], [], []>} : vector<8x32xf32>, vector<32x8xf32>, vector<8x8xf32> -> vector<8x8xf32>
    %c0_9 = arith.constant 0 : index
    %c0_10 = arith.constant 0 : index
    %10 = vector.load %arg5[%c0_9, %c0_10] : memref<1x8xf32, #tpu.memory_space<vmem>>, vector<1x8xf32>
    %11 = vector.broadcast %10 : vector<1x8xf32> to vector<8x8xf32>
    %12 = arith.addf %9, %11 : vector<8x8xf32>
    %cst_11 = arith.constant 0.000000e+00 : f32
    %13 = vector.broadcast %cst_11 : f32 to vector<8x8xf32>
    %14 = arith.maximumf %12, %13 : vector<8x8xf32>
    %c0_12 = arith.constant 0 : index
    %c0_13 = arith.constant 0 : index
    %15 = vector.load %arg6[%c0_12, %c0_13] : memref<1x8xf32, #tpu.memory_space<vmem>>, vector<1x8xf32>
    %cst_14 = arith.constant dense<0.000000e+00> : vector<1x8xf32>
    %16 = tpu.matmul %15, %14, %cst_14 {dimension_numbers = #tpu.dot_dimension_numbers<[1], [1], [0], [0], [0, 0, 1, 0], [], []>} : vector<1x8xf32>, vector<8x8xf32>, vector<1x8xf32> -> vector<1x8xf32>
    %c0_15 = arith.constant 0 : index
    %c0_16 = arith.constant 0 : index
    %17 = vector.load %arg7[%c0_15, %c0_16] : memref<1x1xf32, #tpu.memory_space<vmem>>, vector<1x1xf32>
    %18 = vector.broadcast %17 : vector<1x1xf32> to vector<1x8xf32>
    %19 = arith.addf %16, %18 : vector<1x8xf32>
    %cst_17 = arith.constant 0.000000e+00 : f32
    %20 = vector.broadcast %cst_17 : f32 to vector<1x8xf32>
    %21 = arith.maximumf %19, %20 : vector<1x8xf32>
    %22 = vector.shape_cast %21 : vector<1x8xf32> to vector<1x1x8xf32>
    %c0_18 = arith.constant 0 : index
    %c0_19 = arith.constant 0 : index
    %c0_20 = arith.constant 0 : index
    %23 = vector.load %arg8[%c0_18, %c0_19, %c0_20] : memref<1x1x8xf32, #tpu.memory_space<vmem>>, vector<1x1x8xf32>
    tpu.vector_store %arg8[%c0_18, %c0_19, %c0_20], %22 {strides = array<i32>} : memref<1x1x8xf32, #tpu.memory_space<vmem>>, vector<1x1x8xf32>,
    return
  }
  func.func @transform_0(%arg0: i32) -> (i32, i32) {
    %c0_i32 = arith.constant 0 : i32
    %c0_i32_0 = arith.constant 0 : i32
    return %arg0, %c0_i32 : i32, i32
  }
  func.func @transform_1(%arg0: i32) -> (i32, i32) {
    %c0_i32 = arith.constant 0 : i32
    %c0_i32_0 = arith.constant 0 : i32
    %c0_i32_1 = arith.constant 0 : i32
    return %c0_i32, %c0_i32_0 : i32, i32
  }
  func.func @transform_2(%arg0: i32) -> (i32, i32) {
    %c0_i32 = arith.constant 0 : i32
    %c0_i32_0 = arith.constant 0 : i32
    %c0_i32_1 = arith.constant 0 : i32
    return %c0_i32, %c0_i32_0 : i32, i32
  }
  func.func @transform_3(%arg0: i32) -> (i32, i32) {
    %c0_i32 = arith.constant 0 : i32
    %c0_i32_0 = arith.constant 0 : i32
    %c0_i32_1 = arith.constant 0 : i32
    return %c0_i32, %c0_i32_0 : i32, i32
  }
  func.func @transform_4(%arg0: i32) -> (i32, i32) {
    %c0_i32 = arith.constant 0 : i32
    %c0_i32_0 = arith.constant 0 : i32
    %c0_i32_1 = arith.constant 0 : i32
    return %c0_i32, %c0_i32_0 : i32, i32
  }
  func.func @transform_5(%arg0: i32) -> (i32, i32) {
    %c0_i32 = arith.constant 0 : i32
    %c0_i32_0 = arith.constant 0 : i32
    %c0_i32_1 = arith.constant 0 : i32
    return %c0_i32, %c0_i32_0 : i32, i32
  }
  func.func @transform_6(%arg0: i32) -> (i32, i32) {
    %c0_i32 = arith.constant 0 : i32
    %c0_i32_0 = arith.constant 0 : i32
    %c0_i32_1 = arith.constant 0 : i32
    return %c0_i32, %c0_i32_0 : i32, i32
  }
  func.func @transform_7(%arg0: i32) -> (i32, i32, i32) {
    %c0_i32 = arith.constant 0 : i32
    %c0_i32_0 = arith.constant 0 : i32
    %c0_i32_1 = arith.constant 0 : i32
    return %arg0, %c0_i32, %c0_i32_0 : i32, i32, i32
  }
}

</mosaic_0001>

<bundles_post_ra>
// kernel: tpu_custom_call.1
= control target key start
LH: loop header
LB: loop body
LE: loop exit
PB: predicated region body
PF: predicated region fallthrough
CT: control target
= control target key end

     0   :  { %s451_s0 = inlined_call_operand.vmem [shape: f32[8,16], index: 0, kind: input, shape index: {}]   ;;  %s452_s1 = inlined_call_operand.vmem [shape: f32[16,32], index: 1, kind: input, shape index: {}]   ;;  %s453_s2 = inlined_call_operand.vmem [shape: f32[1,32], index: 2, kind: input, shape index: {}]   ;;  %s454_s3 = inlined_call_operand.vmem [shape: f32[32,8], index: 3, kind: input, shape index: {}]   ;;  %s455_s4 = inlined_call_operand.vmem [shape: f32[1,8], index: 4, kind: input, shape index: {}]   ;;  %s456_s5 = inlined_call_operand.vmem [shape: f32[1,8], index: 5, kind: input, shape index: {}]   ;;  %s457_s6 = inlined_call_operand.<no memory space> [shape: f32[1,1], index: 6, kind: input, shape index: {}]   ;;  %s458_s7 = inlined_call_operand.hbm [shape: f32[1,1,8], index: 7, kind: output, shape index: {}]  }
   0x1   :  { %v12_v0 = vstv %s457_s6 }
   0x2   :  { %13 = vst [vmem:[#allocation2] sm:$0x1] %v12_v0 }
   0x3   :  { %v31_v1 = vld [vmem:[%s452_s1 + $0x8] sm:$0xff]  ;;  %v371_v2 = vmov 0.0   ;;  %v30_v3 = vld [vmem:[%s452_s1] sm:$0xff]  ;;  %vm372_vm0 = vmmov 0   ;;  %v117_v4 = vld [vmem:[%s454_s3 + $0x18] sm:$0xff] }
   0x4   :  { %321 = vmatprep.subr.mxu0 %v371_v2  ;;  %325 = vmatprep.mubr.msk.f32.mxu0 %vm372_vm0, %v371_v2 }
   0x5   :  { %14 = vsyncpa [#allocation4], 0  ;;  %322 = vmatpush3.msra.mxu0 %v31_v1  ;;  %v29_v5 = vld [vmem:[%s451_s0] sm:$0xff]  ;;  %vm39_vm1 = vcmask 130048   ;;  %328 = vmatprep.subr.mxu1 %v371_v2  ;;  %v116_v6 = vld [vmem:[%s454_s3 + $0x10] sm:$0xff]  ;;  %vm125_vm2 = vcmask 261120   ;;  %v207_v22 = vlaneseq }
   0x6   :  { %323 = vmatprep.subr.mxu0 %v371_v2  ;;  %329 = vmatpush3.msra.mxu1 %v117_v4  ;;  %v115_v7 = vld [vmem:[%s454_s3 + $0x8] sm:$0xff]  ;;  %v114_v8 = vld [vmem:[%s454_s3] sm:$0xff]  ;;  %v373_v15 = vmov 0   ;;  %vm211_vm3 = vcmask 64512   ;;  %s374_s18 = smov [#allocation3]   ;;  %vm289_vm4 = vcmask 57344  }
   0x7   :  { %324 = vmatpush3.msra.mxu0 %v30_v3  ;;  %330 = vmatprep.subr.mxu1 %v371_v2  ;;  %v305_v9 = vld [vmem:[%s453_s2] ss:$0 sm:$0xff]  ;;  %v208_v23 = vshrl.u32 %v207_v22, 7  ;;  %s297_s19 = sshll.u32 %s374_s18, 4  ;;  %s298_s19 = int_to_ptr.vmem [resolvable:$true] %s297_s19 }
   0x8   :  { %326 = vmatmul.mubr.msk.f32.vlgmr.msra.gmra.mxu0 %vm39_vm1, %v29_v5  ;;  %336 = vmatprep.mubr.msk.f32.mxu1 %vm372_vm0, %v371_v2  ;;  %v307_v16 = vld [vmem:[%s455_s4] ss:$0 sm:$0xff]  ;;  %s349_s4 = scalar_lea.vmem %s298_s19, 16  ;;  %s353_s20 = scalar_lea.vmem %s298_s19, 32 }
   0x9   :  { %339 = vmatprep.subr.mxu0 %v371_v2  ;;  %341 = vmatprep.mubr.msk.f32.mxu0 %vm372_vm0, %v371_v2  ;;  %v201_v14 = vld [vmem:[#allocation2] sm:$0x1]  ;;  %v209_v24 = vsub.s32 0, %v208_v23  ;;  %p350_p0 = scmp.ne.s32.totalorder %s298_s19, %s349_s4  ;;  %p354_p1 = scmp.lt.s32.totalorder %s298_s19, %s298_s19 }
   0xa   :  { %331 = vmatpush3.msra.mxu1 %v116_v6  ;;  %348 = vset.pattern.permute.xlu0 %v373_v15  ;;  %v200_v21 = vld [vmem:[%s456_s5] sm:$0x1]  ;;  %p355_p2 = scmp.lt.s32.totalorder %s353_s20, %s349_s4 }
   0xb   :  { %332 = vmatprep.subr.mxu1 %v371_v2  ;;  %204 = vperm.xlu0 %348, %v201_v14  }
   0xc   :  { %333 = vmatpush3.msra.mxu1 %v115_v7  ;;  %p356_p3 = por %p355_p2, %p354_p1 }
   0xd   :  { %334 = vmatprep.subr.mxu1 %v371_v2 }
   0xe   :  { %335 = vmatpush3.msra.mxu1 %v114_v8  ;;  %p357_p4 = pnand %p356_p3, %p350_p0 }
  0x86   :  { %v205_v25 = vpop.permute.xlu0 %204 }
  0x87   :  { %v210_v26 = vrot.slane %v205_v25, %v209_v24 }
  0xc8   :  { %v109_v10 = vpop.f32.mrf.mxu0 }
  0xc9   :  { %v110_v11 = vadd.f32 %v305_v9, %v109_v10 }
  0xca   :  { %v327_v12 = vpop.f32.mrf.mxu0 }
  0xcb   :  { %v113_v13 = vmax.f32 %v110_v11, 0.0 }
  0xcd   :  { %337 = vmatmul.mubr.msk.f32.vlgmr.msra.gmra.mxu1 %vm125_vm2, %v113_v13 }
 0x18d   :  { %v195_v17 = vpop.f32.mrf.mxu1 }
 0x18e   :  { %v196_v18 = vadd.f32 %v307_v16, %v195_v17 }
 0x18f   :  { %v338_v19 = vpop.f32.mrf.mxu1 }
 0x190   :  { %v199_v20 = vmax.f32 %v196_v18, 0.0 }
 0x192   :  { %340 = vmatpush3.xpose.msk.msra.mxu0 %vm211_vm3, %v199_v20 }
 0x195   :  { %342 = vmatmul.mubr.msk.f32.vlgmr.msra.gmra.mxu0 %vm211_vm3, %v200_v21 }
 0x255   :  { %v284_v27 = vpop.f32.mrf.mxu0 }
 0x256   :  { %v285_v28 = vadd.f32 %v284_v27, %v210_v26 }
 0x257   :  { %v343_v29 = vpop.f32.mrf.mxu0 }
 0x258   :  { %v288_v30 = vmax.f32 %v285_v28, 0.0 }
 0x25a   :  { %290 = vst.msk [vmem:[#allocation3] sm:$0x1] %vm289_vm4, %v288_v30 }
 0x25b   :  { %360 = shalt.err (!%p357_p4)
}
 0x25c   :  { %300 = dma.vmem_to_hbm [thread:$0]  %s298_s19, 16, %s458_s7, [#allocation4]  }
 0x25d   :  { %369 = dma.done.wait [#allocation4], 16  }
 0x25e   :  { %370 = vsyncadd [#allocation4], 4294967280 }
 0x25f   :  { %304 = vsyncpa [#allocation4], 1 }

</bundles_post_ra>
